<compile_context>
chip_gen: v7x
topology: tpu7x:2x2x1
jax: 0.10.0
libtpu: 0.0.40
codegen_flags: <defaults>
</compile_context>

<pallas_src>
import jax
import jax.numpy as jnp
from jax.experimental import pallas as pl
from jax.experimental.pallas import tpu as pltpu

N_CLASSES = 100          # logical output width
N_OUT_PAD = 128          # lane-dense padded output width


def _mlp_kernel(x_ref, we_ref, be_ref,
                w1_ref, b1_ref, w2_ref, b2_ref, w3_ref, b3_ref,
                o_ref):
    # in-kernel f32 -> bf16 cast (VPU; essentially free under MXU-bound body)
    x = x_ref[...].astype(jnp.bfloat16)
    # encoder projection: [TM, D_in]bf16 @ [D_in, 128]bf16 -> f32 acc
    h = jnp.dot(x, we_ref[...], preferred_element_type=jnp.float32)
    h = jnp.maximum(h + be_ref[...], 0.0).astype(jnp.bfloat16)
    # classifier layer 1: 128 -> 512
    h = jnp.dot(h, w1_ref[...], preferred_element_type=jnp.float32)
    h = jnp.maximum(h + b1_ref[...], 0.0).astype(jnp.bfloat16)
    # classifier layer 2: 512 -> 256
    h = jnp.dot(h, w2_ref[...], preferred_element_type=jnp.float32)
    h = jnp.maximum(h + b2_ref[...], 0.0).astype(jnp.bfloat16)
    # classifier layer 3: 256 -> 128 (padded logits, no activation), f32 out
    o_ref[...] = (jnp.dot(h, w3_ref[...], preferred_element_type=jnp.float32)
                  + b3_ref[...])


def _pick_tm(batch):
    """Adaptive batch tile: multiple of 16 (bf16 sublane), capped per chip."""
    try:
        kind = jax.devices()[0].device_kind.lower()
    except Exception:  # pragma: no cover - defensive; default is fine everywhere
        kind = ""
    tm_max = 128 if "v5" in kind else 256   # v5e: 4x128 MXU; v6e/v7x: 2x256
    b16 = 16 * pl.cdiv(batch, 16)
    if b16 <= tm_max:
        return b16                          # single tile, minimal padding
    if b16 <= 2 * tm_max:
        # split into (at least) 2 grid steps so both v7x TensorCores get work
        return 16 * pl.cdiv(pl.cdiv(b16, 16), 2)
    return tm_max


def comp_model_forward(x_nchw, params):
    """x_nchw: [B, C, H, W] float32.  Returns logits [B, 100] float32."""
    B = x_nchw.shape[0]
    # same flatten order as torch .view(B, -1); stays f32 (cast in-kernel)
    x_flat = x_nchw.reshape(B, -1)
    d_in = x_flat.shape[1]

    (we, be, w1, b1, w2, b2, w3, b3) = params
    d_enc, d1 = we.shape[1], w1.shape[1]
    d2, n_out_pad = w2.shape[1], w3.shape[1]

    # adaptive batch tile; pad only up to the chosen tile multiple if needed
    tm = _pick_tm(B)
    b_pad = tm * pl.cdiv(B, tm)
    if b_pad != B:
        x_flat = jnp.pad(x_flat, ((0, b_pad - B), (0, 0)))

    grid = (b_pad // tm,)

    # batch-tiled activation / output; weights & biases stay resident
    x_spec = pl.BlockSpec((tm, d_in), lambda i: (i, 0))
    o_spec = pl.BlockSpec((tm, n_out_pad), lambda i: (i, 0))

    def _resident(arr):
        return pl.BlockSpec(arr.shape, lambda i: (0, 0))

    w_list = (we, be, w1, b1, w2, b2, w3, b3)
    w_specs = [_resident(a) for a in w_list]

    flops = 2 * b_pad * (d_in * d_enc + d_enc * d1 + d1 * d2 + d2 * n_out_pad)
    weight_bytes = sum(int(a.size) * a.dtype.itemsize for a in w_list)
    bytes_accessed = (int(x_flat.size) * 4) + weight_bytes + (b_pad * n_out_pad * 4)

    out = pl.pallas_call(
        _mlp_kernel,
        out_shape=jax.ShapeDtypeStruct((b_pad, n_out_pad), jnp.float32),
        grid_spec=pltpu.PrefetchScalarGridSpec(
            num_scalar_prefetch=0,
            grid=grid,
            in_specs=[x_spec] + w_specs,
            out_specs=o_spec,
        ),
        compiler_params=pltpu.CompilerParams(
            dimension_semantics=("parallel",),   # shard batch tiles across TCs
            vmem_limit_bytes=32 * 1024 * 1024,
        ),
        cost_estimate=pl.CostEstimate(
            flops=flops, transcendentals=0, bytes_accessed=bytes_accessed),
    )(x_flat, *w_list)

    # strip batch pad and the 100->128 output-lane pad
    return out[:B, :N_CLASSES]


def init_params(key, d_in, d_enc=128, d1=512, d2=256, d_out=N_CLASSES):
    """PyTorch-style uniform(-1/sqrt(fan_in), 1/sqrt(fan_in)) init.

    Weights are stored as [in, out] bf16 (kernel computes x @ W, equivalent to
    PyTorch's x @ W.T).  Biases stay f32.  The final layer's output dim is
    zero-padded from 100 to 128 for lane-dense stores."""
    dims = [(d_in, d_enc), (d_enc, d1), (d1, d2), (d2, d_out)]
    params = []
    for li, (fan_in, fan_out) in enumerate(dims):
        key, kw, kb = jax.random.split(key, 3)
        bound = 1.0 / jnp.sqrt(fan_in)
        w = jax.random.uniform(kw, (fan_in, fan_out), jnp.float32, -bound, bound)
        b = jax.random.uniform(kb, (1, fan_out), jnp.float32, -bound, bound)
        if li == len(dims) - 1 and fan_out < N_OUT_PAD:
            w = jnp.pad(w, ((0, 0), (0, N_OUT_PAD - fan_out)))
            b = jnp.pad(b, ((0, 0), (0, N_OUT_PAD - fan_out)))
        params.extend([w.astype(jnp.bfloat16), b])
    return tuple(params)


def reference_forward(x_nchw, params):
    """Plain-JAX reference following the same bf16-matmul / f32-accumulate path."""
    (we, be, w1, b1, w2, b2, w3, b3) = params
    h = x_nchw.reshape(x_nchw.shape[0], -1).astype(jnp.bfloat16)
    h = jnp.maximum(jnp.dot(h, we, preferred_element_type=jnp.float32) + be,
                    0.0).astype(jnp.bfloat16)
    h = jnp.maximum(jnp.dot(h, w1, preferred_element_type=jnp.float32) + b1,
                    0.0).astype(jnp.bfloat16)
    h = jnp.maximum(jnp.dot(h, w2, preferred_element_type=jnp.float32) + b2,
                    0.0).astype(jnp.bfloat16)
    logits = jnp.dot(h, w3, preferred_element_type=jnp.float32) + b3
    return logits[:, :N_CLASSES]


if __name__ == "__main__":
    key = jax.random.PRNGKey(0)
    k_x, k_p = jax.random.split(key)

    # small NCHW input consistent with the module: batch=2, channels=4, 16x16
    B, C, H, W = 2, 4, 16, 16
    x = jax.random.normal(k_x, (B, C, H, W), jnp.float32)

    params = init_params(k_p, d_in=C * H * W)

    out = comp_model_forward(x, params)
    out = jax.block_until_ready(out)

    ref = reference_forward(x, params)
    assert out.shape == (B, N_CLASSES), out.shape
    assert jnp.allclose(out, ref, atol=2e-2, rtol=2e-2), "mismatch vs reference"

    print("KERNEL_OK")
</pallas_src>

<mosaic_0001>
module attributes {stable_mosaic.version = 11 : i64} {
  func.func @_mlp_kernel(%arg0: i32, %arg1: memref<16x1024xf32, #tpu.memory_space<vmem>>, %arg2: memref<1024x128xbf16, #tpu.memory_space<vmem>>, %arg3: memref<1x128xf32, #tpu.memory_space<vmem>>, %arg4: memref<128x512xbf16, #tpu.memory_space<vmem>>, %arg5: memref<1x512xf32, #tpu.memory_space<vmem>>, %arg6: memref<512x256xbf16, #tpu.memory_space<vmem>>, %arg7: memref<1x256xf32, #tpu.memory_space<vmem>>, %arg8: memref<256x128xbf16, #tpu.memory_space<vmem>>, %arg9: memref<1x128xf32, #tpu.memory_space<vmem>>, %arg10: memref<16x128xf32, #tpu.memory_space<vmem>>) attributes {dimension_semantics = [#tpu.dimension_semantics<parallel>], iteration_bounds = array<i64: 1>, scalar_prefetch = 0 : i64, scratch_operands = 0 : i64, tpu.core_type = #tpu.core_type<tc>, window_params = [{transform_indices = @transform_0, window_bounds = array<i64: 16, 1024>}, {pipeline_mode = #tpu.pipeline_mode<synchronous>, transform_indices = @transform_1, window_bounds = array<i64: 1024, 128>}, {pipeline_mode = #tpu.pipeline_mode<synchronous>, transform_indices = @transform_2, window_bounds = array<i64: 1, 128>}, {pipeline_mode = #tpu.pipeline_mode<synchronous>, transform_indices = @transform_3, window_bounds = array<i64: 128, 512>}, {pipeline_mode = #tpu.pipeline_mode<synchronous>, transform_indices = @transform_4, window_bounds = array<i64: 1, 512>}, {pipeline_mode = #tpu.pipeline_mode<synchronous>, transform_indices = @transform_5, window_bounds = array<i64: 512, 256>}, {pipeline_mode = #tpu.pipeline_mode<synchronous>, transform_indices = @transform_6, window_bounds = array<i64: 1, 256>}, {pipeline_mode = #tpu.pipeline_mode<synchronous>, transform_indices = @transform_7, window_bounds = array<i64: 256, 128>}, {pipeline_mode = #tpu.pipeline_mode<synchronous>, transform_indices = @transform_8, window_bounds = array<i64: 1, 128>}, {transform_indices = @transform_9, window_bounds = array<i64: 16, 128>}]} {
    %c0 = arith.constant 0 : index
    %c0_0 = arith.constant 0 : index
    %0 = vector.load %arg1[%c0, %c0_0] : memref<16x1024xf32, #tpu.memory_space<vmem>>, vector<16x1024xf32>
    %1 = arith.truncf %0 : vector<16x1024xf32> to vector<16x1024xbf16>
    %c0_1 = arith.constant 0 : index
    %c0_2 = arith.constant 0 : index
    %2 = vector.load %arg2[%c0_1, %c0_2] : memref<1024x128xbf16, #tpu.memory_space<vmem>>, vector<1024x128xbf16>
    %cst = arith.constant dense<0.000000e+00> : vector<16x128xf32>
    %3 = tpu.matmul %1, %2, %cst {dimension_numbers = #tpu.dot_dimension_numbers<[1], [0], [0], [1], [0, 0, 1, 1], [], []>} : vector<16x1024xbf16>, vector<1024x128xbf16>, vector<16x128xf32> -> vector<16x128xf32>
    %c0_3 = arith.constant 0 : index
    %c0_4 = arith.constant 0 : index
    %4 = vector.load %arg3[%c0_3, %c0_4] : memref<1x128xf32, #tpu.memory_space<vmem>>, vector<1x128xf32>
    %5 = vector.broadcast %4 : vector<1x128xf32> to vector<16x128xf32>
    %6 = arith.addf %3, %5 : vector<16x128xf32>
    %cst_5 = arith.constant 0.000000e+00 : f32
    %7 = vector.broadcast %cst_5 : f32 to vector<16x128xf32>
    %8 = arith.maximumf %6, %7 : vector<16x128xf32>
    %9 = arith.truncf %8 : vector<16x128xf32> to vector<16x128xbf16>
    %c0_6 = arith.constant 0 : index
    %c0_7 = arith.constant 0 : index
    %10 = vector.load %arg4[%c0_6, %c0_7] : memref<128x512xbf16, #tpu.memory_space<vmem>>, vector<128x512xbf16>
    %cst_8 = arith.constant dense<0.000000e+00> : vector<16x512xf32>
    %11 = tpu.matmul %9, %10, %cst_8 {dimension_numbers = #tpu.dot_dimension_numbers<[1], [0], [0], [1], [0, 0, 1, 1], [], []>} : vector<16x128xbf16>, vector<128x512xbf16>, vector<16x512xf32> -> vector<16x512xf32>
    %c0_9 = arith.constant 0 : index
    %c0_10 = arith.constant 0 : index
    %12 = vector.load %arg5[%c0_9, %c0_10] : memref<1x512xf32, #tpu.memory_space<vmem>>, vector<1x512xf32>
    %13 = vector.broadcast %12 : vector<1x512xf32> to vector<16x512xf32>
    %14 = arith.addf %11, %13 : vector<16x512xf32>
    %cst_11 = arith.constant 0.000000e+00 : f32
    %15 = vector.broadcast %cst_11 : f32 to vector<16x512xf32>
    %16 = arith.maximumf %14, %15 : vector<16x512xf32>
    %17 = arith.truncf %16 : vector<16x512xf32> to vector<16x512xbf16>
    %c0_12 = arith.constant 0 : index
    %c0_13 = arith.constant 0 : index
    %18 = vector.load %arg6[%c0_12, %c0_13] : memref<512x256xbf16, #tpu.memory_space<vmem>>, vector<512x256xbf16>
    %cst_14 = arith.constant dense<0.000000e+00> : vector<16x256xf32>
    %19 = tpu.matmul %17, %18, %cst_14 {dimension_numbers = #tpu.dot_dimension_numbers<[1], [0], [0], [1], [0, 0, 1, 1], [], []>} : vector<16x512xbf16>, vector<512x256xbf16>, vector<16x256xf32> -> vector<16x256xf32>
    %c0_15 = arith.constant 0 : index
    %c0_16 = arith.constant 0 : index
    %20 = vector.load %arg7[%c0_15, %c0_16] : memref<1x256xf32, #tpu.memory_space<vmem>>, vector<1x256xf32>
    %21 = vector.broadcast %20 : vector<1x256xf32> to vector<16x256xf32>
    %22 = arith.addf %19, %21 : vector<16x256xf32>
    %cst_17 = arith.constant 0.000000e+00 : f32
    %23 = vector.broadcast %cst_17 : f32 to vector<16x256xf32>
    %24 = arith.maximumf %22, %23 : vector<16x256xf32>
    %25 = arith.truncf %24 : vector<16x256xf32> to vector<16x256xbf16>
    %c0_18 = arith.constant 0 : index
    %c0_19 = arith.constant 0 : index
    %26 = vector.load %arg8[%c0_18, %c0_19] : memref<256x128xbf16, #tpu.memory_space<vmem>>, vector<256x128xbf16>
    %cst_20 = arith.constant dense<0.000000e+00> : vector<16x128xf32>
    %27 = tpu.matmul %25, %26, %cst_20 {dimension_numbers = #tpu.dot_dimension_numbers<[1], [0], [0], [1], [0, 0, 1, 1], [], []>} : vector<16x256xbf16>, vector<256x128xbf16>, vector<16x128xf32> -> vector<16x128xf32>
    %c0_21 = arith.constant 0 : index
    %c0_22 = arith.constant 0 : index
    %28 = vector.load %arg9[%c0_21, %c0_22] : memref<1x128xf32, #tpu.memory_space<vmem>>, vector<1x128xf32>
    %29 = vector.broadcast %28 : vector<1x128xf32> to vector<16x128xf32>
    %30 = arith.addf %27, %29 : vector<16x128xf32>
    %c0_23 = arith.constant 0 : index
    %c0_24 = arith.constant 0 : index
    %31 = vector.load %arg10[%c0_23, %c0_24] : memref<16x128xf32, #tpu.memory_space<vmem>>, vector<16x128xf32>
    tpu.vector_store %arg10[%c0_23, %c0_24], %30 {strides = array<i32>} : memref<16x128xf32, #tpu.memory_space<vmem>>, vector<16x128xf32>,
    return
  }
  func.func @transform_0(%arg0: i32) -> (i32, i32) {
    %c0_i32 = arith.constant 0 : i32
    %c0_i32_0 = arith.constant 0 : i32
    return %arg0, %c0_i32 : i32, i32
  }
  func.func @transform_1(%arg0: i32) -> (i32, i32) {
    %c0_i32 = arith.constant 0 : i32
    %c0_i32_0 = arith.constant 0 : i32
    %c0_i32_1 = arith.constant 0 : i32
    return %c0_i32, %c0_i32_0 : i32, i32
  }
  func.func @transform_2(%arg0: i32) -> (i32, i32) {
    %c0_i32 = arith.constant 0 : i32
    %c0_i32_0 = arith.constant 0 : i32
    %c0_i32_1 = arith.constant 0 : i32
    return %c0_i32, %c0_i32_0 : i32, i32
  }
  func.func @transform_3(%arg0: i32) -> (i32, i32) {
    %c0_i32 = arith.constant 0 : i32
    %c0_i32_0 = arith.constant 0 : i32
    %c0_i32_1 = arith.constant 0 : i32
    return %c0_i32, %c0_i32_0 : i32, i32
  }
  func.func @transform_4(%arg0: i32) -> (i32, i32) {
    %c0_i32 = arith.constant 0 : i32
    %c0_i32_0 = arith.constant 0 : i32
    %c0_i32_1 = arith.constant 0 : i32
    return %c0_i32, %c0_i32_0 : i32, i32
  }
  func.func @transform_5(%arg0: i32) -> (i32, i32) {
    %c0_i32 = arith.constant 0 : i32
    %c0_i32_0 = arith.constant 0 : i32
    %c0_i32_1 = arith.constant 0 : i32
    return %c0_i32, %c0_i32_0 : i32, i32
  }
  func.func @transform_6(%arg0: i32) -> (i32, i32) {
    %c0_i32 = arith.constant 0 : i32
    %c0_i32_0 = arith.constant 0 : i32
    %c0_i32_1 = arith.constant 0 : i32
    return %c0_i32, %c0_i32_0 : i32, i32
  }
  func.func @transform_7(%arg0: i32) -> (i32, i32) {
    %c0_i32 = arith.constant 0 : i32
    %c0_i32_0 = arith.constant 0 : i32
    %c0_i32_1 = arith.constant 0 : i32
    return %c0_i32, %c0_i32_0 : i32, i32
  }
  func.func @transform_8(%arg0: i32) -> (i32, i32) {
    %c0_i32 = arith.constant 0 : i32
    %c0_i32_0 = arith.constant 0 : i32
    %c0_i32_1 = arith.constant 0 : i32
    return %c0_i32, %c0_i32_0 : i32, i32
  }
  func.func @transform_9(%arg0: i32) -> (i32, i32) {
    %c0_i32 = arith.constant 0 : i32
    %c0_i32_0 = arith.constant 0 : i32
    return %arg0, %c0_i32 : i32, i32
  }
}

</mosaic_0001>

<bundles_post_ra>
// kernel: tpu_custom_call.1
= control target key start
LH: loop header
LB: loop body
LE: loop exit
PB: predicated region body
PF: predicated region fallthrough
CT: control target
= control target key end

     0   :  { %14 = vsyncpa [#allocation3], 0  ;;  %s2661_s0 = inlined_call_operand.hbm [shape: f32[16,1024], index: 0, kind: input, shape index: {}]   ;;  %s2662_s1 = inlined_call_operand.hbm [shape: bf16[1024,128], index: 1, kind: input, shape index: {}]   ;;  %s2663_s2 = inlined_call_operand.vmem [shape: f32[1,128], index: 2, kind: input, shape index: {}]   ;;  %s2664_s3 = inlined_call_operand.hbm [shape: bf16[128,512], index: 3, kind: input, shape index: {}]   ;;  %s2665_s4 = inlined_call_operand.vmem [shape: f32[1,512], index: 4, kind: input, shape index: {}]   ;;  %s2666_s5 = inlined_call_operand.hbm [shape: bf16[512,256], index: 5, kind: input, shape index: {}]   ;;  %s2667_s6 = inlined_call_operand.vmem [shape: f32[1,256], index: 6, kind: input, shape index: {}]   ;;  %s2668_s7 = inlined_call_operand.hbm [shape: bf16[256,128], index: 7, kind: input, shape index: {}]   ;;  %s2669_s8 = inlined_call_operand.vmem [shape: f32[1,128], index: 8, kind: input, shape index: {}]   ;;  %s2670_s9 = inlined_call_operand.hbm [shape: f32[16,128], index: 9, kind: output, shape index: {}]  }
   0x1   :  { %15 = vsyncpa [#allocation6], 0 }
   0x2   :  { %16 = vsyncpa [#allocation9], 0 }
   0x3   :  { %17 = vsyncpa [#allocation4], 0  ;;  %s2483_s30 = smov [#allocation5]   ;;  %s2343_s13 = scalar_lea.hbm %s2662_s1, 8192 }
   0x4   :  { %s35_s10 = sshll.u32 %s2483_s30, 4  ;;  %p2344_p0 = scmp.ne.s32.totalorder %s2662_s1, %s2343_s13  ;;  %s36_s10 = int_to_ptr.vmem [resolvable:$true] %s35_s10 }
   0x5   :  { %p2347_p1 = scmp.lt.u32.totalorder %s2343_s13, %s2662_s1 }
   0x7   :  { %p2349_p2 = pnand %p2347_p1, %p2344_p0 }
   0x9   :  { %2352 = shalt.err (!%p2349_p2)
}
   0xa   :  { %s2353_s18 = scalar_lea.vmem %s36_s10, 8192  ;;  %p2358_p4 = scmp.lt.s32.totalorder %s36_s10, %s36_s10 }
   0xb   :  { %p2354_p3 = scmp.ne.s32.totalorder %s36_s10, %s2353_s18  ;;  %p2359_p5 = scmp.lt.s32.totalorder %s2353_s18, %s2353_s18 }
   0xd   :  { %p2360_p6 = por %p2359_p5, %p2358_p4 }
   0xf   :  { %p2361_p7 = pnand %p2360_p6, %p2354_p3 }
  0x11   :  { %2364 = shalt.err (!%p2361_p7)
}
  0x12   :  { %s2484_s19 = smov 64   ;;  %s2485_s20 = smov 4  }
  0x13   :  { %41 = dma.hbm_to_vmem [thread:$0]  %s2662_s1, 8192, %s36_s10, [#allocation6], %s2484_s19, %s2484_s19, %s2485_s20  }
  0x14   :  { %s2486_s23 = smov [#allocation8]   ;;  %s2365_s27 = scalar_lea.hbm %s2666_s5, 8192 }
  0x15   :  { %s63_s24 = sshll.u32 %s2486_s23, 4  ;;  %p2366_p8 = scmp.ne.s32.totalorder %s2666_s5, %s2365_s27  ;;  %s64_s24 = int_to_ptr.vmem [resolvable:$true] %s63_s24 }
  0x16   :  { %p2369_p9 = scmp.lt.u32.totalorder %s2365_s27, %s2666_s5 }
  0x18   :  { %p2371_p10 = pnand %p2369_p9, %p2366_p8 }
  0x1a   :  { %2374 = shalt.err (!%p2371_p10)
}
  0x1b   :  { %s2375_s12 = scalar_lea.vmem %s64_s24, 8192  ;;  %p2380_p12 = scmp.lt.s32.totalorder %s64_s24, %s64_s24 }
  0x1c   :  { %p2376_p11 = scmp.ne.s32.totalorder %s64_s24, %s2375_s12  ;;  %p2381_p13 = scmp.lt.s32.totalorder %s2375_s12, %s2375_s12 }
  0x1e   :  { %p2382_p0 = por %p2381_p13, %p2380_p12 }
  0x20   :  { %p2383_p1 = pnand %p2382_p0, %p2376_p11 }
  0x22   :  { %2386 = shalt.err (!%p2383_p1)
}
  0x23   :  { %s2487_s1 = smov 128   ;;  %s2488_s10 = smov 8  }
  0x24   :  { %69 = dma.hbm_to_vmem [thread:$0]  %s2666_s5, 8192, %s64_s24, [#allocation9], %s2487_s1, %s2487_s1, %s2488_s10  }
  0x25   :  { %s2489_s15 = smov [#allocation2]   ;;  %s2490_s17 = smov [#allocation7]  }
  0x26   :  { %s23_s16 = sshll.u32 %s2489_s15, 4  ;;  %s49_s18 = sshll.u32 %s2490_s17, 4  ;;  %s24_s16 = int_to_ptr.vmem [resolvable:$true] %s23_s16  ;;  %s50_s18 = int_to_ptr.vmem [resolvable:$true] %s49_s18 }
  0x27   :  { %s2387_s23 = scalar_lea.hbm %s2661_s0, 2048 }
  0x28   :  { %p2388_p2 = scmp.ne.s32.totalorder %s2661_s0, %s2387_s23  ;;  %p2391_p3 = scmp.lt.u32.totalorder %s2387_s23, %s2661_s0 }
  0x2a   :  { %p2393_p4 = pnand %p2391_p3, %p2388_p2 }
  0x2c   :  { %2396 = shalt.err (!%p2393_p4)
}
  0x2d   :  { %s2397_s5 = scalar_lea.vmem %s24_s16, 2048  ;;  %p2402_p6 = scmp.lt.s32.totalorder %s24_s16, %s24_s16 }
  0x2e   :  { %p2398_p5 = scmp.ne.s32.totalorder %s24_s16, %s2397_s5  ;;  %p2403_p7 = scmp.lt.s32.totalorder %s2397_s5, %s2397_s5 }
  0x30   :  { %p2404_p8 = por %p2403_p7, %p2402_p6 }
  0x32   :  { %p2405_p9 = pnand %p2404_p8, %p2398_p5 }
  0x34   :  { %2408 = shalt.err (!%p2405_p9)
}
  0x35   :  { %s2491_s24 = smov 1024   ;;  %s2409_s13 = scalar_lea.hbm %s2664_s3, 4096 }
  0x36   :  { %29 = dma.hbm_to_vmem [thread:$0]  %s2661_s0, 2048, %s24_s16, [#allocation3], %s2491_s24, %s2491_s24, %s2484_s19  }
  0x37   :  { %p2410_p10 = scmp.ne.s32.totalorder %s2664_s3, %s2409_s13  ;;  %p2413_p11 = scmp.lt.u32.totalorder %s2409_s13, %s2664_s3 }
  0x39   :  { %p2415_p12 = pnand %p2413_p11, %p2410_p10 }
  0x3b   :  { %2418 = shalt.err (!%p2415_p12)
}
  0x3c   :  { %s2419_s22 = scalar_lea.vmem %s50_s18, 4096  ;;  %p2424_p0 = scmp.lt.s32.totalorder %s50_s18, %s50_s18 }
  0x3d   :  { %p2420_p13 = scmp.ne.s32.totalorder %s50_s18, %s2419_s22  ;;  %p2425_p1 = scmp.lt.s32.totalorder %s2419_s22, %s2419_s22 }
  0x3f   :  { %p2426_p2 = por %p2425_p1, %p2424_p0 }
  0x41   :  { %p2427_p3 = pnand %p2426_p2, %p2420_p13 }
  0x43   :  { %2430 = shalt.err (!%p2427_p3)
}
  0x44   :  { %s2492_s0 = smov 256   ;;  %s2493_s16 = smov 16  }
  0x45   :  { %55 = dma.hbm_to_vmem [thread:$0]  %s2664_s3, 4096, %s50_s18, [#allocation6], %s2492_s0, %s2492_s0, %s2493_s16  }
  0x46   :  { %s2494_s26 = smov [#allocation10]   ;;  %s2431_s24 = scalar_lea.hbm %s2668_s7, 2048 }
  0x47   :  { %s77_s27 = sshll.u32 %s2494_s26, 4  ;;  %p2432_p4 = scmp.ne.s32.totalorder %s2668_s7, %s2431_s24  ;;  %s78_s27 = int_to_ptr.vmem [resolvable:$true] %s77_s27 }
  0x48   :  { %p2435_p5 = scmp.lt.u32.totalorder %s2431_s24, %s2668_s7 }
  0x4a   :  { %p2437_p6 = pnand %p2435_p5, %p2432_p4 }
  0x4c   :  { %2440 = shalt.err (!%p2437_p6)
}
  0x4d   :  { %s2441_s13 = scalar_lea.vmem %s78_s27, 2048  ;;  %p2446_p8 = scmp.lt.s32.totalorder %s78_s27, %s78_s27 }
  0x4e   :  { %p2442_p7 = scmp.ne.s32.totalorder %s78_s27, %s2441_s13  ;;  %p2447_p9 = scmp.lt.s32.totalorder %s2441_s13, %s2441_s13 }
  0x50   :  { %p2448_p10 = por %p2447_p9, %p2446_p8 }
  0x52   :  { %p2449_p11 = pnand %p2448_p10, %p2442_p7 }
  0x54   :  { %2452 = shalt.err (!%p2449_p11)
}
  0x55   :  { %83 = dma.hbm_to_vmem [thread:$0]  %s2668_s7, 2048, %s78_s27, [#allocation9], %s2484_s19, %s2484_s19, %s2485_s20  }
  0x56   :  { %2475 = dma.done.wait [#allocation3], 2048  }
  0x57   :  { %2476 = vsyncadd [#allocation3], 4294965248 }
  0x58   :  { %2477 = dma.done.wait [#allocation6], 12288  }
  0x59   :  { %2478 = vsyncadd [#allocation6], 4294955008 }
  0x5a   :  { %2479 = dma.done.wait [#allocation9], 10240  }
  0x5b   :  { %2480 = vsyncadd [#allocation9], 4294957056  ;;  %v2119_v0 = vld [vmem:[#allocation5 + $0x40] sm:$0xff]   ;;  %v2121_v2 = vld [vmem:[#allocation5 + $0x48] sm:$0xff]   ;;  %s2496_s17 = smov [#allocation11]  }
  0x5c   :  { %v2120_v1 = vld [vmem:[#allocation5] sm:$0xff]   ;;  %1987 = vmatprep.subr.bf16.mxu1 %v2119_v0  ;;  %v2122_v3 = vld [vmem:[#allocation5 + $0x8] sm:$0xff]   ;;  %v2123_v4 = vld [vmem:[#allocation5 + $0x50] sm:$0xff]   ;;  %s1795_s21 = sshll.u32 %s2496_s17, 4  ;;  %s1796_s21 = int_to_ptr.vmem [resolvable:$true] %s1795_s21 }
  0x5d   :  { %1988 = vmatpush3.bf16.msra.mxu1 %v2120_v1  ;;  %v2124_v5 = vld [vmem:[#allocation5 + $0x10] sm:$0xff]   ;;  %v2125_v6 = vld [vmem:[#allocation5 + $0x58] sm:$0xff]   ;;  %v2127_v8 = vld [vmem:[#allocation5 + $0x60] sm:$0xff]   ;;  %s2453_s22 = scalar_lea.vmem %s1796_s21, 256  ;;  %p2458_p13 = scmp.lt.s32.totalorder %s1796_s21, %s1796_s21 }
  0x5e   :  { %1989 = vmatprep.subr.bf16.mxu1 %v2121_v2  ;;  %v2126_v7 = vld [vmem:[#allocation5 + $0x18] sm:$0xff]   ;;  %v2128_v9 = vld [vmem:[#allocation5 + $0x20] sm:$0xff]   ;;  %v2129_v10 = vld [vmem:[#allocation5 + $0x68] sm:$0xff]   ;;  %p2454_p12 = scmp.ne.s32.totalorder %s1796_s21, %s2453_s22  ;;  %p2459_p0 = scmp.lt.s32.totalorder %s2453_s22, %s2453_s22 }
  0x5f   :  { %v103_v11 = vld [vmem:[#allocation2 + $0x8] sm:$0xff]  ;;  %v2131_v15 = vld [vmem:[#allocation5 + $0x70] sm:$0xff]   ;;  %v2137_v16 = vld [vmem:[#allocation5 + $0x140] sm:$0xff]  }
  0x60   :  { %v111_v12 = vld [vmem:[#allocation2 + $0x48] sm:$0xff]  ;;  %v2138_v17 = vld [vmem:[#allocation5 + $0x100] sm:$0xff]   ;;  %v2132_v18 = vld [vmem:[#allocation5 + $0x30] sm:$0xff]   ;;  %2031 = vmatprep.subr.bf16.mxu0 %v2137_v16  ;;  %p2460_p1 = por %p2459_p0, %p2458_p13 }
  0x61   :  { %1990 = vmatpush3.bf16.msra.mxu1 %v2122_v3  ;;  %v119_v13 = vpack.c.bf16 %v111_v12, %v103_v11  ;;  %v2130_v14 = vld [vmem:[#allocation5 + $0x28] sm:$0xff]   ;;  %v2133_v19 = vld [vmem:[#allocation5 + $0x78] sm:$0xff]   ;;  %2032 = vmatpush3.bf16.msra.mxu0 %v2138_v17  ;;  %v102_v22 = vld [vmem:[#allocation2] sm:$0xff] }
  0x62   :  { %1991 = vmatprep.subr.bf16.mxu1 %v2123_v4  ;;  %v2141_v20 = vld [vmem:[#allocation5 + $0x148] sm:$0xff]   ;;  %v2134_v21 = vld [vmem:[#allocation5 + $0x38] sm:$0xff]   ;;  %v110_v24 = vld [vmem:[#allocation2 + $0x40] sm:$0xff]  ;;  %p2461_p2 = pnand %p2460_p1, %p2454_p12 }
  0x63   :  { %677 = vmatprep.mubr.bf16.mxu1 %v119_v13  ;;  %v2142_v23 = vld [vmem:[#allocation5 + $0x108] sm:$0xff]   ;;  %2033 = vmatprep.subr.bf16.mxu0 %v2141_v20  ;;  %v2135_v25 = vld [vmem:[#allocation5 + $0xc0] sm:$0xff]   ;;  %v2145_v26 = vld [vmem:[#allocation5 + $0x150] sm:$0xff]   ;;  %v118_v28 = vpack.c.bf16 %v110_v24, %v102_v22 }
  0x64   :  { %v2146_v27 = vld [vmem:[#allocation5 + $0x110] sm:$0xff]   ;;  %v2136_v29 = vld [vmem:[#allocation5 + $0x80] sm:$0xff]   ;;  %v2139_v30 = vld [vmem:[#allocation5 + $0xc8] sm:$0xff]  }
  0x65   :  { %1992 = vmatpush3.bf16.msra.mxu1 %v2124_v5  ;;  %2034 = vmatpush3.bf16.msra.mxu0 %v2142_v23  ;;  %v2149_v31 = vld [vmem:[#allocation5 + $0x158] sm:$0xff]   ;;  %v2140_v33 = vld [vmem:[#allocation5 + $0x88] sm:$0xff]   ;;  %v2143_v34 = vld [vmem:[#allocation5 + $0xd0] sm:$0xff]  }
  0x66   :  { %1993 = vmatprep.subr.bf16.mxu1 %v2125_v6  ;;  %2035 = vmatprep.subr.bf16.mxu0 %v2145_v26  ;;  %v2150_v32 = vld [vmem:[#allocation5 + $0x118] sm:$0xff]   ;;  %v2153_v35 = vld [vmem:[#allocation5 + $0x160] sm:$0xff]   ;;  %v2144_v37 = vld [vmem:[#allocation5 + $0x90] sm:$0xff]  }
  0x67   :  { %v2154_v36 = vld [vmem:[#allocation5 + $0x120] sm:$0xff]   ;;  %v2147_v38 = vld [vmem:[#allocation5 + $0xd8] sm:$0xff]   ;;  %v2157_v39 = vld [vmem:[#allocation5 + $0x168] sm:$0xff]  }
  0x68   :  { %v2158_v40 = vld [vmem:[#allocation5 + $0x128] sm:$0xff]   ;;  %v2148_v41 = vld [vmem:[#allocation5 + $0x98] sm:$0xff]   ;;  %v2151_v42 = vld [vmem:[#allocation5 + $0xe0] sm:$0xff]  }
  0x69   :  { %1994 = vmatpush3.bf16.msra.mxu1 %v2126_v7  ;;  %2036 = vmatpush3.bf16.msra.mxu0 %v2146_v27  ;;  %v2161_v43 = vld [vmem:[#allocation5 + $0x170] sm:$0xff]   ;;  %v2152_v45 = vld [vmem:[#allocation5 + $0xa0] sm:$0xff]   ;;  %v2155_v46 = vld [vmem:[#allocation5 + $0xe8] sm:$0xff]  }
  0x6a   :  { %1995 = vmatprep.subr.bf16.mxu1 %v2127_v8  ;;  %2037 = vmatprep.subr.bf16.mxu0 %v2149_v31  ;;  %v2162_v44 = vld [vmem:[#allocation5 + $0x130] sm:$0xff]   ;;  %v2165_v47 = vld [vmem:[#allocation5 + $0x178] sm:$0xff]   ;;  %v2156_v52 = vld [vmem:[#allocation5 + $0xa8] sm:$0xff]  }
  0x6b   :  { %v105_v48 = vld [vmem:[#allocation2 + $0x18] sm:$0xff]  ;;  %v2159_v53 = vld [vmem:[#allocation5 + $0xf0] sm:$0xff]   ;;  %v107_v54 = vld [vmem:[#allocation2 + $0x28] sm:$0xff] }
  0x6c   :  { %v113_v49 = vld [vmem:[#allocation2 + $0x58] sm:$0xff]  ;;  %v115_v55 = vld [vmem:[#allocation2 + $0x68] sm:$0xff]  ;;  %v106_v57 = vld [vmem:[#allocation2 + $0x20] sm:$0xff] }
  0x6d   :  { %1996 = vmatpush3.bf16.msra.mxu1 %v2128_v9  ;;  %2038 = vmatpush3.bf16.msra.mxu0 %v2150_v32  ;;  %v121_v50 = vpack.c.bf16 %v113_v49, %v105_v48  ;;  %v2166_v51 = vld [vmem:[#allocation5 + $0x138] sm:$0xff]   ;;  %v123_v56 = vpack.c.bf16 %v115_v55, %v107_v54  ;;  %v114_v58 = vld [vmem:[#allocation2 + $0x60] sm:$0xff]  ;;  %v2160_v60 = vld [vmem:[#allocation5 + $0xb0] sm:$0xff]  }
  0x6e   :  { %1997 = vmatprep.subr.bf16.mxu1 %v2129_v10  ;;  %2039 = vmatprep.subr.bf16.mxu0 %v2153_v35  ;;  %v122_v59 = vpack.c.bf16 %v114_v58, %v106_v57  ;;  %v2163_v61 = vld [vmem:[#allocation5 + $0xf8] sm:$0xff]   ;;  %v104_v63 = vld [vmem:[#allocation2 + $0x10] sm:$0xff]  ;;  %v2167_v1 = vld [vmem:[#allocation5 + $0x1c0] sm:$0xff]  }
  0x6f   :  { %759 = vmatprep.mubr.bf16.mxu0 %v123_v56  ;;  %v2164_v62 = vld [vmem:[#allocation5 + $0xb8] sm:$0xff]   ;;  %v112_v0 = vld [vmem:[#allocation2 + $0x50] sm:$0xff]  ;;  %v2168_v3 = vld [vmem:[#allocation5 + $0x180] sm:$0xff]   ;;  %v2495_v56 = vmov 0  }
  0x70   :  { %v120_v2 = vpack.c.bf16 %v112_v0, %v104_v63  ;;  %v2169_v4 = vld [vmem:[#allocation5 + $0x1c8] sm:$0xff]   ;;  %v2171_v6 = vld [vmem:[#allocation5 + $0x1d0] sm:$0xff]   ;;  %v109_v7 = vld [vmem:[#allocation2 + $0x38] sm:$0xff] }
  0x71   :  { %1998 = vmatpush3.bf16.msra.mxu1 %v2130_v14  ;;  %2040 = vmatpush3.bf16.msra.mxu0 %v2154_v36  ;;  %v2170_v5 = vld [vmem:[#allocation5 + $0x188] sm:$0xff]   ;;  %v117_v8 = vld [vmem:[#allocation2 + $0x78] sm:$0xff]  ;;  %v2172_v9 = vld [vmem:[#allocation5 + $0x190] sm:$0xff]  }
  0x72   :  { %1999 = vmatprep.subr.bf16.mxu1 %v2131_v15  ;;  %2041 = vmatprep.subr.bf16.mxu0 %v2157_v39  ;;  %v125_v10 = vpack.c.bf16 %v117_v8, %v109_v7  ;;  %v2173_v11 = vld [vmem:[#allocation5 + $0x1d8] sm:$0xff]   ;;  %v2175_v13 = vld [vmem:[#allocation5 + $0x1e0] sm:$0xff]   ;;  %v2177_v15 = vld [vmem:[#allocation5 + $0x1e8] sm:$0xff]  }
  0x73   :  { %v2174_v12 = vld [vmem:[#allocation5 + $0x198] sm:$0xff]   ;;  %v2176_v14 = vld [vmem:[#allocation5 + $0x1a0] sm:$0xff]   ;;  %v2178_v16 = vld [vmem:[#allocation5 + $0x1a8] sm:$0xff]  }
  0x74   :  { %v2179_v17 = vld [vmem:[#allocation5 + $0x1f0] sm:$0xff]   ;;  %v2182_v20 = vld [vmem:[#allocation5 + $0x1b8] sm:$0xff]   ;;  %v2233_v57 = vld [vmem:[#allocation8 + $0x4] ss:$8 sps:$4 sm:$0xff]  }
  0x75   :  { %2000 = vmatpush3.bf16.msra.mxu1 %v2132_v18  ;;  %2042 = vmatpush3.bf16.msra.mxu0 %v2158_v40  ;;  %v2180_v18 = vld [vmem:[#allocation5 + $0x1b0] sm:$0xff]   ;;  %v2186_v26 = vld [vmem:[#allocation7 + $0x8] ss:$16 sps:$4 sm:$0xff]   ;;  %v2188_v27 = vld [vmem:[#allocation7 + $0xc] ss:$16 sps:$4 sm:$0xff]  }
  0x76   :  { %2001 = vmatprep.subr.bf16.mxu1 %v2133_v19  ;;  %2043 = vmatprep.subr.bf16.mxu0 %v2161_v43  ;;  %v2181_v19 = vld [vmem:[#allocation5 + $0x1f8] sm:$0xff]   ;;  %v116_v22 = vld [vmem:[#allocation2 + $0x70] sm:$0xff] }
  0x77   :  { %v2183_v24 = vld [vmem:[#allocation7] ss:$16 sps:$4 sm:$0xff]   ;;  %v2192_v31 = vld [vmem:[#allocation7 + $0x28] ss:$16 sps:$4 sm:$0xff]   ;;  %v2197_v32 = vld [vmem:[#allocation7 + $0x44] ss:$16 sps:$4 sm:$0xff]  }
  0x78   :  { %v2198_v35 = vld [vmem:[#allocation7 + $0x48] ss:$16 sps:$4 sm:$0xff]   ;;  %v2203_v36 = vld [vmem:[#allocation7 + $0x64] ss:$16 sps:$4 sm:$0xff]   ;;  %v2224_v49 = vld [vmem:[#allocation7 + $0xcc] ss:$16 sps:$4 sm:$0xff]  }
  0x79   :  { %2002 = vmatpush3.bf16.msra.mxu1 %v2134_v21  ;;  %2044 = vmatpush3.bf16.msra.mxu0 %v2162_v44  ;;  %v108_v21 = vld [vmem:[#allocation2 + $0x30] sm:$0xff]  ;;  %v2204_v39 = vld [vmem:[#allocation7 + $0x68] ss:$16 sps:$4 sm:$0xff]  }
  0x7a   :  { %2009 = vmatprep.subr.bf16.mxu1 %v2135_v25  ;;  %2045 = vmatprep.subr.bf16.mxu0 %v2165_v47  ;;  %v124_v23 = vpack.c.bf16 %v116_v22, %v108_v21  ;;  %v2185_v25 = vld [vmem:[#allocation7 + $0x4] ss:$16 sps:$4 sm:$0xff]   ;;  %v2210_v43 = vld [vmem:[#allocation7 + $0x88] ss:$16 sps:$4 sm:$0xff]   ;;  %v2225_v54 = vld [vmem:[#allocation7 + $0xe0] ss:$16 sps:$4 sm:$0xff]  }
  0x7b   :  { %v2209_v40 = vld [vmem:[#allocation7 + $0x84] ss:$16 sps:$4 sm:$0xff]   ;;  %v2216_v47 = vld [vmem:[#allocation7 + $0xa8] ss:$16 sps:$4 sm:$0xff]  }
  0x7c   :  { %678 = vmatmul.mubr.bf16.vlgmr.msra.gmra.mrb[0].mxu1 %v118_v28  ;;  %v2191_v28 = vld [vmem:[#allocation7 + $0x24] ss:$16 sps:$4 sm:$0xff]   ;;  %v2228_v55 = vld [vmem:[#allocation7 + $0xe8] ss:$16 sps:$4 sm:$0xff]  }
  0x7d   :  { %2010 = vmatpush3.bf16.msra.mxu1 %v2136_v29  ;;  %718 = vmatprep.mubr.bf16.mxu1 %v121_v50  ;;  %v2194_v29 = vld [vmem:[#allocation7 + $0x2c] ss:$16 sps:$4 sm:$0xff]   ;;  %v2215_v44 = vld [vmem:[#allocation7 + $0xa4] ss:$16 sps:$4 sm:$0xff]   ;;  %v2219_v50 = vld [vmem:[#allocation7 + $0xc0] ss:$16 sps:$4 sm:$0xff]  }
  0x7e   :  { %2011 = vmatprep.subr.bf16.mxu1 %v2139_v30  ;;  %2046 = vmatpush3.bf16.msra.mxu0 %v2166_v51  ;;  %v2189_v30 = vld [vmem:[#allocation7 + $0x20] ss:$16 sps:$4 sm:$0xff]   ;;  %v2221_v48 = vld [vmem:[#allocation7 + $0xc4] ss:$16 sps:$4 sm:$0xff]   ;;  %v2222_v51 = vld [vmem:[#allocation7 + $0xc8] ss:$16 sps:$4 sm:$0xff]  }
  0x7f   :  { %1026 = vmatprep.subr.bf16.mxu0 %v2185_v25 }
  0x81   :  { %2012 = vmatpush3.bf16.msra.mxu1 %v2140_v33  ;;  %760 = vmatmul.mubr.bf16.vlgmr.msra.gmra.mrb[0].mxu0 %v122_v59  ;;  %v2200_v33 = vld [vmem:[#allocation7 + $0x4c] ss:$16 sps:$4 sm:$0xff]  }
  0x82   :  { %2013 = vmatprep.subr.bf16.mxu1 %v2143_v34  ;;  %1027 = vmatpush1.bf16.msra.mxu0 %v2183_v24  ;;  %v2195_v34 = vld [vmem:[#allocation7 + $0x40] ss:$16 sps:$4 sm:$0xff]  }
  0x83   :  { %1028 = vmatprep.subr.bf16.mxu0 %v2191_v28  ;;  %1058 = vmatprep.mubr.bf16.mxu0 %v2495_v56 }
  0x85   :  { %2014 = vmatpush3.bf16.msra.mxu1 %v2144_v37  ;;  %v2206_v37 = vld [vmem:[#allocation7 + $0x6c] ss:$16 sps:$4 sm:$0xff]  }
  0x86   :  { %2015 = vmatprep.subr.bf16.mxu1 %v2147_v38  ;;  %1029 = vmatpush1.bf16.msra.mxu0 %v2189_v30  ;;  %v2201_v38 = vld [vmem:[#allocation7 + $0x60] ss:$16 sps:$4 sm:$0xff]  }
  0x87   :  { %1030 = vmatprep.subr.bf16.mxu0 %v2197_v32  ;;  %v2234_v32 = vld [vmem:[#allocation8 + $0x10] ss:$8 sps:$4 sm:$0xff]  }
  0x89   :  { %2016 = vmatpush3.bf16.msra.mxu1 %v2148_v41  ;;  %v2212_v41 = vld [vmem:[#allocation7 + $0x8c] ss:$16 sps:$4 sm:$0xff]  }
  0x8a   :  { %2017 = vmatprep.subr.bf16.mxu1 %v2151_v42  ;;  %1031 = vmatpush1.bf16.msra.mxu0 %v2195_v34  ;;  %v2207_v42 = vld [vmem:[#allocation7 + $0x80] ss:$16 sps:$4 sm:$0xff]  }
  0x8b   :  { %1032 = vmatprep.subr.bf16.mxu0 %v2203_v36  ;;  %v2237_v34 = vld [vmem:[#allocation8 + $0x20] ss:$8 sps:$4 sm:$0xff]   ;;  %v2240_v36 = vld [vmem:[#allocation8 + $0x30] ss:$8 sps:$4 sm:$0xff]  }
  0x8d   :  { %2018 = vmatpush3.bf16.msra.mxu1 %v2152_v45  ;;  %v2218_v45 = vld [vmem:[#allocation7 + $0xac] ss:$16 sps:$4 sm:$0xff]  }
  0x8e   :  { %2019 = vmatprep.subr.bf16.mxu1 %v2155_v46  ;;  %1033 = vmatpush1.bf16.msra.mxu0 %v2201_v38  ;;  %v2213_v46 = vld [vmem:[#allocation7 + $0xa0] ss:$16 sps:$4 sm:$0xff]  }
  0x8f   :  { %1034 = vmatprep.subr.bf16.mxu0 %v2209_v40  ;;  %v2243_v38 = vld [vmem:[#allocation8 + $0x40] ss:$8 sps:$4 sm:$0xff]   ;;  %v2246_v40 = vld [vmem:[#allocation8 + $0x50] ss:$8 sps:$4 sm:$0xff]  }
  0x91   :  { %2020 = vmatpush3.bf16.msra.mxu1 %v2156_v52  ;;  %v2227_v52 = vld [vmem:[#allocation7 + $0xe4] ss:$16 sps:$4 sm:$0xff]  }
  0x92   :  { %2021 = vmatprep.subr.bf16.mxu1 %v2159_v53  ;;  %1035 = vmatpush1.bf16.msra.mxu0 %v2207_v42  ;;  %v2230_v53 = vld [vmem:[#allocation7 + $0xec] ss:$16 sps:$4 sm:$0xff]   ;;  %v2249_v42 = vld [vmem:[#allocation8 + $0x60] ss:$8 sps:$4 sm:$0xff]  }
  0x93   :  { %1036 = vmatprep.subr.bf16.mxu0 %v2215_v44  ;;  %v2252_v44 = vld [vmem:[#allocation8 + $0x70] ss:$8 sps:$4 sm:$0xff]  }
  0x95   :  { %2022 = vmatpush3.bf16.msra.mxu1 %v2160_v60 }
  0x96   :  { %2023 = vmatprep.subr.bf16.mxu1 %v2163_v61  ;;  %1037 = vmatpush1.bf16.msra.mxu0 %v2213_v46  ;;  %v2255_v46 = vld [vmem:[#allocation8 + $0x80] ss:$8 sps:$4 sm:$0xff]  }
  0x97   :  { %1038 = vmatprep.subr.bf16.mxu0 %v2221_v48  ;;  %v2258_v48 = vld [vmem:[#allocation8 + $0x90] ss:$8 sps:$4 sm:$0xff]  }
  0x99   :  { %2024 = vmatpush3.bf16.msra.mxu1 %v2164_v62 }
  0x9a   :  { %2053 = vmatprep.subr.bf16.mxu1 %v2167_v1  ;;  %1039 = vmatpush1.bf16.msra.mxu0 %v2219_v50  ;;  %v2261_v50 = vld [vmem:[#allocation8 + $0xa0] ss:$8 sps:$4 sm:$0xff]  }
  0x9b   :  { %1040 = vmatprep.subr.bf16.mxu0 %v2227_v52  ;;  %v2264_v52 = vld [vmem:[#allocation8 + $0xb0] ss:$8 sps:$4 sm:$0xff]  }
  0x9c   :  { %719 = vmatmul.mubr.bf16.vlgmr.msra.gmra.mrb[4].mxu1 %v120_v2 }
  0x9d   :  { %2054 = vmatpush3.bf16.msra.mxu1 %v2168_v3  ;;  %800 = vmatprep.mubr.bf16.mxu1 %v125_v10 }
  0x9e   :  { %2055 = vmatprep.subr.bf16.mxu1 %v2169_v4  ;;  %1041 = vmatpush1.bf16.msra.mxu0 %v2225_v54  ;;  %v2267_v54 = vld [vmem:[#allocation8 + $0xc0] ss:$8 sps:$4 sm:$0xff]  }
  0x9f   :  { %1520 = vmatprep.subr.bf16.mxu0 %v2233_v57  ;;  %v2275_v57 = vld [vmem:[#allocation8 + $0xe4] ss:$8 sps:$4 sm:$0xff]  }
  0xa1   :  { %2056 = vmatpush3.bf16.msra.mxu1 %v2170_v5 }
  0xa2   :  { %2057 = vmatprep.subr.bf16.mxu1 %v2171_v6  ;;  %v1809_v6 = vld [vmem:[%s2663_s2] ss:$0 sm:$0xff] }
  0xa5   :  { %2058 = vmatpush3.bf16.msra.mxu1 %v2172_v9 }
  0xa6   :  { %2059 = vmatprep.subr.bf16.mxu1 %v2173_v11 }
  0xa9   :  { %2060 = vmatpush3.bf16.msra.mxu1 %v2174_v12 }
  0xaa   :  { %2061 = vmatprep.subr.bf16.mxu1 %v2175_v13 }
  0xad   :  { %2062 = vmatpush3.bf16.msra.mxu1 %v2176_v14 }
  0xae   :  { %2063 = vmatprep.subr.bf16.mxu1 %v2177_v15 }
  0xb1   :  { %2064 = vmatpush3.bf16.msra.mxu1 %v2178_v16 }
  0xb2   :  { %2065 = vmatprep.subr.bf16.mxu1 %v2179_v17 }
  0xb5   :  { %2066 = vmatpush3.bf16.msra.mxu1 %v2180_v18 }
  0xb6   :  { %2067 = vmatprep.subr.bf16.mxu1 %v2181_v19 }
  0xb9   :  { %2068 = vmatpush3.bf16.msra.mxu1 %v2182_v20 }
  0xba   :  { %1069 = vmatprep.subr.bf16.mxu1 %v2188_v27 }
  0xbc   :  { %801 = vmatmul.mubr.bf16.vlgmr.msra.gmra.mrb[8].mxu1 %v124_v23 }
  0xbd   :  { %1070 = vmatpush1.bf16.msra.mxu1 %v2186_v26  ;;  %1101 = vmatprep.mubr.bf16.mxu1 %v2495_v56  ;;  %v2270_v56 = vld [vmem:[#allocation8 + $0xd0] ss:$8 sps:$4 sm:$0xff]  }
  0xbe   :  { %1071 = vmatprep.subr.bf16.mxu1 %v2194_v29  ;;  %v2231_v29 = vld [vmem:[#allocation8] ss:$8 sps:$4 sm:$0xff]  }
  0xc1   :  { %1072 = vmatpush1.bf16.msra.mxu1 %v2192_v31  ;;  %v2236_v31 = vld [vmem:[#allocation8 + $0x14] ss:$8 sps:$4 sm:$0xff]  }
  0xc2   :  { %1073 = vmatprep.subr.bf16.mxu1 %v2200_v33  ;;  %v2239_v33 = vld [vmem:[#allocation8 + $0x24] ss:$8 sps:$4 sm:$0xff]  }
  0xc5   :  { %1074 = vmatpush1.bf16.msra.mxu1 %v2198_v35  ;;  %v2242_v35 = vld [vmem:[#allocation8 + $0x34] ss:$8 sps:$4 sm:$0xff]  }
  0xc6   :  { %1075 = vmatprep.subr.bf16.mxu1 %v2206_v37  ;;  %v2245_v37 = vld [vmem:[#allocation8 + $0x44] ss:$8 sps:$4 sm:$0xff]  }
  0xc9   :  { %1076 = vmatpush1.bf16.msra.mxu1 %v2204_v39  ;;  %v2248_v39 = vld [vmem:[#allocation8 + $0x54] ss:$8 sps:$4 sm:$0xff]  }
  0xca   :  { %1077 = vmatprep.subr.bf16.mxu1 %v2212_v41  ;;  %v2251_v41 = vld [vmem:[#allocation8 + $0x64] ss:$8 sps:$4 sm:$0xff]  }
  0xcd   :  { %1078 = vmatpush1.bf16.msra.mxu1 %v2210_v43  ;;  %v2254_v43 = vld [vmem:[#allocation8 + $0x74] ss:$8 sps:$4 sm:$0xff]  }
  0xce   :  { %1079 = vmatprep.subr.bf16.mxu1 %v2218_v45  ;;  %v2257_v45 = vld [vmem:[#allocation8 + $0x84] ss:$8 sps:$4 sm:$0xff]  }
  0xd1   :  { %1080 = vmatpush1.bf16.msra.mxu1 %v2216_v47  ;;  %v2260_v47 = vld [vmem:[#allocation8 + $0x94] ss:$8 sps:$4 sm:$0xff]  }
  0xd2   :  { %1081 = vmatprep.subr.bf16.mxu1 %v2224_v49  ;;  %v2263_v49 = vld [vmem:[#allocation8 + $0xa4] ss:$8 sps:$4 sm:$0xff]  }
  0xd5   :  { %1082 = vmatpush1.bf16.msra.mxu1 %v2222_v51  ;;  %v2266_v51 = vld [vmem:[#allocation8 + $0xb4] ss:$8 sps:$4 sm:$0xff]  }
  0xd6   :  { %1083 = vmatprep.subr.bf16.mxu1 %v2230_v53  ;;  %v2269_v53 = vld [vmem:[#allocation8 + $0xc4] ss:$8 sps:$4 sm:$0xff]  }
  0xd9   :  { %1084 = vmatpush1.bf16.msra.mxu1 %v2228_v55  ;;  %v2272_v55 = vld [vmem:[#allocation8 + $0xd4] ss:$8 sps:$4 sm:$0xff]  }
 0x14f   :  { %v2003_v58 = vpop.f32.mrb[0].mxu1 }
 0x150   :  { %v2004_v59 = vpop.f32.mrb[1].mxu1 }
 0x151   :  { %v2005_v60 = vadd.f32 %v2004_v59, %v2003_v58  ;;  %v2006_v61 = vpop.f32.mrb[2].mxu1  ;;  %v2273_v58 = vld [vmem:[#allocation8 + $0xe0] ss:$8 sps:$4 sm:$0xff]   ;;  %v2278_v59 = vld [vmem:[#allocation8 + $0xf4] ss:$8 sps:$4 sm:$0xff]  }
 0x152   :  { %v2007_v62 = vpop.f32.mrb[3].mxu1 }
 0x153   :  { %v2008_v63 = vadd.f32 %v2007_v62, %v2006_v61  ;;  %v680_v9 = vadd.f32 %v2005_v60, %v1809_v6  ;;  %v2276_v60 = vld [vmem:[#allocation8 + $0xf0] ss:$8 sps:$4 sm:$0xff]   ;;  %v2281_v61 = vld [vmem:[#allocation8 + $0x104] ss:$8 sps:$4 sm:$0xff]  }
 0x154   :  { %v2047_v0 = vpop.f32.mrb[0].mxu0  ;;  %v2327_v62 = vld [vmem:[#allocation10 + $0x40] sm:$0xff]  }
 0x155   :  { %v2048_v1 = vpop.f32.mrb[1].mxu0  ;;  %v683_v13 = vadd.f32 %v2008_v63, %v1809_v6  ;;  %v2328_v63 = vld [vmem:[#allocation10] sm:$0xff]   ;;  %2075 = vmatprep.subr.bf16.mxu1 %v2327_v62  ;;  %v2300_v62 = vld [vmem:[#allocation8 + $0x170] ss:$8 sps:$4 sm:$0xff]  }
 0x156   :  { %v2049_v2 = vadd.f32 %v2048_v1, %v2047_v0  ;;  %v2050_v3 = vpop.f32.mrb[2].mxu0  ;;  %v2329_v0 = vld [vmem:[#allocation10 + $0x48] sm:$0xff]   ;;  %v2335_v6 = vld [vmem:[#allocation10 + $0x60] sm:$0xff]  }
 0x157   :  { %v2051_v4 = vpop.f32.mrb[3].mxu0  ;;  %v2330_v1 = vld [vmem:[#allocation10 + $0x8] sm:$0xff]  }
 0x158   :  { %v2052_v5 = vadd.f32 %v2051_v4, %v2050_v3  ;;  %v2332_v3 = vld [vmem:[#allocation10 + $0x10] sm:$0xff]   ;;  %v2333_v4 = vld [vmem:[#allocation10 + $0x58] sm:$0xff]  }
 0x16f   :  { %v2025_v7 = vpop.f32.mrb[4].mxu1 }
 0x170   :  { %v2026_v8 = vpop.f32.mrb[5].mxu1 }
 0x171   :  { %v2027_v10 = vadd.f32 %v2026_v8, %v2025_v7  ;;  %v2028_v11 = vpop.f32.mrb[6].mxu1  ;;  %v2336_v7 = vld [vmem:[#allocation10 + $0x20] sm:$0xff]   ;;  %v2337_v8 = vld [vmem:[#allocation10 + $0x68] sm:$0xff]  }
 0x172   :  { %v2029_v12 = vpop.f32.mrb[7].mxu1 }
 0x173   :  { %v721_v14 = vadd.f32 %v2027_v10, %v680_v9  ;;  %v2030_v15 = vadd.f32 %v2029_v12, %v2028_v11  ;;  %v846_v9 = vlaneseq }
 0x175   :  { %v724_v16 = vadd.f32 %v2030_v15, %v683_v13  ;;  %v762_v17 = vadd.f32 %v2049_v2, %v721_v14  ;;  %v2331_v2 = vld [vmem:[#allocation10 + $0x50] sm:$0xff]   ;;  %v2620_v10 = vshrl.u32 %v846_v9, 7  ;;  %v844_v13 = vld [vmem:[%s2665_s4] sm:$0xf] }
 0x176   :  { %v2320_v9 = vld [vmem:[#allocation8 + $0x1d4] ss:$8 sps:$4 sm:$0xff]  }
 0x177   :  { %v765_v18 = vadd.f32 %v2052_v5, %v724_v16  ;;  %v2334_v5 = vld [vmem:[#allocation10 + $0x18] sm:$0xff]   ;;  %v848_v11 = vsub.s32 0, %v2620_v10  ;;  %v856_v12 = vsub.s32 2, %v2620_v10  ;;  %v852_v14 = vsub.s32 1, %v2620_v10 }
 0x178   :  { %v860_v15 = vsub.s32 3, %v2620_v10  ;;  %v1970_v10 = vld [vmem:[%s2669_s8] ss:$0 sm:$0xff] }
 0x179   :  { %v849_v16 = vrot.slane %v844_v13, %v848_v11 }
 0x18f   :  { %v2069_v19 = vpop.f32.mrb[8].mxu1 }
 0x190   :  { %v2070_v20 = vpop.f32.mrb[9].mxu1 }
 0x191   :  { %v2071_v21 = vadd.f32 %v2070_v20, %v2069_v19  ;;  %v2072_v22 = vpop.f32.mrb[10].mxu1  ;;  %v861_v19 = vrot.slane %v844_v13, %v860_v15  ;;  %v2321_v15 = vld [vmem:[#allocation8 + $0x1e0] ss:$8 sps:$4 sm:$0xff]  }
 0x192   :  { %v2073_v23 = vpop.f32.mrb[11].mxu1 }
 0x193   :  { %v803_v24 = vadd.f32 %v2071_v21, %v762_v17  ;;  %v2074_v25 = vadd.f32 %v2073_v23, %v2072_v22  ;;  %v857_v17 = vrot.slane %v844_v13, %v856_v12  ;;  %v2318_v12 = vld [vmem:[#allocation8 + $0x1d0] ss:$8 sps:$4 sm:$0xff]  }
 0x195   :  { %v806_v26 = vadd.f32 %v2074_v25, %v765_v18  ;;  %v809_v27 = vmax.f32 %v803_v24, 0.0  ;;  %v853_v18 = vrot.slane %v844_v13, %v852_v14  ;;  %v2323_v13 = vld [vmem:[#allocation8 + $0x1e4] ss:$8 sps:$4 sm:$0xff]  }
 0x197   :  { %v810_v28 = vmax.f32 %v806_v26, 0.0 }
 0x199   :  { %v811_v30 = vpack.c.bf16 %v810_v28, %v809_v27 }
 0x19b   :  { %1059 = vmatmul.mubr.bf16.vlgmr.msra.gmra.mrb[4].mxu0 %v811_v30  ;;  %1102 = vmatmul.mubr.bf16.vlgmr.msra.gmra.mrb[12].mxu1 %v811_v30 }
 0x19c   :  { %1521 = vmatpush1.bf16.msra.mxu0 %v2231_v29  ;;  %2076 = vmatpush3.bf16.msra.mxu1 %v2328_v63  ;;  %v2305_v63 = vld [vmem:[#allocation8 + $0x184] ss:$8 sps:$4 sm:$0xff]  }
 0x19d   :  { %1522 = vmatprep.subr.bf16.mxu0 %v2236_v31  ;;  %2077 = vmatprep.subr.bf16.mxu1 %v2329_v0  ;;  %v2303_v0 = vld [vmem:[#allocation8 + $0x180] ss:$8 sps:$4 sm:$0xff]  }
 0x1a0   :  { %1523 = vmatpush1.bf16.msra.mxu0 %v2234_v32  ;;  %2078 = vmatpush3.bf16.msra.mxu1 %v2330_v1  ;;  %v2308_v1 = vld [vmem:[#allocation8 + $0x194] ss:$8 sps:$4 sm:$0xff]  }
 0x1a1   :  { %1524 = vmatprep.subr.bf16.mxu0 %v2239_v33  ;;  %2079 = vmatprep.subr.bf16.mxu1 %v2331_v2  ;;  %v2306_v2 = vld [vmem:[#allocation8 + $0x190] ss:$8 sps:$4 sm:$0xff]  }
 0x1a4   :  { %1525 = vmatpush1.bf16.msra.mxu0 %v2237_v34  ;;  %2080 = vmatpush3.bf16.msra.mxu1 %v2332_v3  ;;  %v2311_v3 = vld [vmem:[#allocation8 + $0x1a4] ss:$8 sps:$4 sm:$0xff]  }
 0x1a5   :  { %1526 = vmatprep.subr.bf16.mxu0 %v2242_v35  ;;  %2081 = vmatprep.subr.bf16.mxu1 %v2333_v4  ;;  %v2309_v4 = vld [vmem:[#allocation8 + $0x1a0] ss:$8 sps:$4 sm:$0xff]  }
 0x1a8   :  { %1527 = vmatpush1.bf16.msra.mxu0 %v2240_v36  ;;  %2082 = vmatpush3.bf16.msra.mxu1 %v2334_v5  ;;  %v2314_v5 = vld [vmem:[#allocation8 + $0x1b4] ss:$8 sps:$4 sm:$0xff]  }
 0x1a9   :  { %1528 = vmatprep.subr.bf16.mxu0 %v2245_v37  ;;  %2083 = vmatprep.subr.bf16.mxu1 %v2335_v6  ;;  %v2312_v6 = vld [vmem:[#allocation8 + $0x1b0] ss:$8 sps:$4 sm:$0xff]  }
 0x1ac   :  { %1529 = vmatpush1.bf16.msra.mxu0 %v2243_v38  ;;  %2084 = vmatpush3.bf16.msra.mxu1 %v2336_v7  ;;  %v2317_v7 = vld [vmem:[#allocation8 + $0x1c4] ss:$8 sps:$4 sm:$0xff]  }
 0x1ad   :  { %1530 = vmatprep.subr.bf16.mxu0 %v2248_v39  ;;  %2085 = vmatprep.subr.bf16.mxu1 %v2337_v8  ;;  %v2315_v8 = vld [vmem:[#allocation8 + $0x1c0] ss:$8 sps:$4 sm:$0xff]  }
 0x1b0   :  { %1531 = vmatpush1.bf16.msra.mxu0 %v2246_v40 }
 0x1b1   :  { %1532 = vmatprep.subr.bf16.mxu0 %v2251_v41 }
 0x1b4   :  { %1533 = vmatpush1.bf16.msra.mxu0 %v2249_v42 }
 0x1b5   :  { %1534 = vmatprep.subr.bf16.mxu0 %v2254_v43 }
 0x1b8   :  { %1535 = vmatpush1.bf16.msra.mxu0 %v2252_v44 }
 0x1b9   :  { %1536 = vmatprep.subr.bf16.mxu0 %v2257_v45 }
 0x1bc   :  { %1537 = vmatpush1.bf16.msra.mxu0 %v2255_v46 }
 0x1bd   :  { %1538 = vmatprep.subr.bf16.mxu0 %v2260_v47 }
 0x1c0   :  { %1539 = vmatpush1.bf16.msra.mxu0 %v2258_v48  ;;  %v2279_v48 = vld [vmem:[#allocation8 + $0x100] ss:$8 sps:$4 sm:$0xff]  }
 0x1c1   :  { %1540 = vmatprep.subr.bf16.mxu0 %v2263_v49  ;;  %v2284_v49 = vld [vmem:[#allocation8 + $0x114] ss:$8 sps:$4 sm:$0xff]  }
 0x1c4   :  { %1541 = vmatpush1.bf16.msra.mxu0 %v2261_v50  ;;  %v2282_v50 = vld [vmem:[#allocation8 + $0x110] ss:$8 sps:$4 sm:$0xff]  }
 0x1c5   :  { %1542 = vmatprep.subr.bf16.mxu0 %v2266_v51  ;;  %v2287_v51 = vld [vmem:[#allocation8 + $0x124] ss:$8 sps:$4 sm:$0xff]  }
 0x1c8   :  { %1543 = vmatpush1.bf16.msra.mxu0 %v2264_v52  ;;  %v2285_v52 = vld [vmem:[#allocation8 + $0x120] ss:$8 sps:$4 sm:$0xff]  }
 0x1c9   :  { %1544 = vmatprep.subr.bf16.mxu0 %v2269_v53  ;;  %v2290_v53 = vld [vmem:[#allocation8 + $0x134] ss:$8 sps:$4 sm:$0xff]  }
 0x1cc   :  { %1545 = vmatpush1.bf16.msra.mxu0 %v2267_v54  ;;  %v2288_v54 = vld [vmem:[#allocation8 + $0x130] ss:$8 sps:$4 sm:$0xff]  }
 0x1cd   :  { %1546 = vmatprep.subr.bf16.mxu0 %v2272_v55  ;;  %v2293_v55 = vld [vmem:[#allocation8 + $0x144] ss:$8 sps:$4 sm:$0xff]  }
 0x1d0   :  { %1547 = vmatpush1.bf16.msra.mxu0 %v2270_v56  ;;  %v2291_v56 = vld [vmem:[#allocation8 + $0x140] ss:$8 sps:$4 sm:$0xff]  }
 0x1d1   :  { %1548 = vmatprep.subr.bf16.mxu0 %v2275_v57  ;;  %v2296_v57 = vld [vmem:[#allocation8 + $0x154] ss:$8 sps:$4 sm:$0xff]  }
 0x1d4   :  { %1549 = vmatpush1.bf16.msra.mxu0 %v2273_v58  ;;  %v2294_v58 = vld [vmem:[#allocation8 + $0x150] ss:$8 sps:$4 sm:$0xff]  }
 0x1d5   :  { %1550 = vmatprep.subr.bf16.mxu0 %v2278_v59  ;;  %v2299_v59 = vld [vmem:[#allocation8 + $0x164] ss:$8 sps:$4 sm:$0xff]  }
 0x1d8   :  { %1551 = vmatpush1.bf16.msra.mxu0 %v2276_v60  ;;  %v2297_v60 = vld [vmem:[#allocation8 + $0x160] ss:$8 sps:$4 sm:$0xff]  }
 0x1d9   :  { %1563 = vmatprep.subr.bf16.mxu0 %v2281_v61  ;;  %v2302_v61 = vld [vmem:[#allocation8 + $0x174] ss:$8 sps:$4 sm:$0xff]  }
 0x26e   :  { %v1060_v20 = vpop.f32.mrb[4].mxu0  ;;  %v1103_v21 = vpop.f32.mrb[12].mxu1 }
 0x26f   :  { %v1061_v22 = vadd.f32 %v1060_v20, %v849_v16  ;;  %v1104_v23 = vadd.f32 %v1103_v21, %v857_v17  ;;  %v1062_v24 = vpop.f32.mrb[5].mxu0  ;;  %v1105_v25 = vpop.f32.mrb[13].mxu1  ;;  %v2340_v20 = vld [vmem:[#allocation10 + $0x30] sm:$0xff]   ;;  %v2341_v21 = vld [vmem:[#allocation10 + $0x78] sm:$0xff]  }
 0x270   :  { %v1063_v26 = vadd.f32 %v1062_v24, %v853_v18  ;;  %v1106_v27 = vadd.f32 %v1105_v25, %v861_v19  ;;  %v1064_v28 = vpop.f32.mrb[6].mxu0  ;;  %v1107_v29 = vpop.f32.mrb[14].mxu1 }
 0x271   :  { %v1065_v30 = vadd.f32 %v1064_v28, %v849_v16  ;;  %v1108_v31 = vadd.f32 %v1107_v29, %v857_v17  ;;  %v1066_v32 = vpop.f32.mrb[7].mxu0  ;;  %v1109_v33 = vpop.f32.mrb[15].mxu1  ;;  %v1112_v36 = vmax.f32 %v1061_v22, 0.0  ;;  %v1114_v37 = vmax.f32 %v1104_v23, 0.0  ;;  %v2326_v16 = vld [vmem:[#allocation8 + $0x1f4] ss:$8 sps:$4 sm:$0xff]  }
 0x272   :  { %v1067_v34 = vadd.f32 %v1066_v32, %v853_v18  ;;  %v1110_v35 = vadd.f32 %v1109_v33, %v861_v19  ;;  %v1113_v40 = vmax.f32 %v1063_v26, 0.0  ;;  %v1115_v41 = vmax.f32 %v1106_v27, 0.0  ;;  %v2324_v17 = vld [vmem:[#allocation8 + $0x1f0] ss:$8 sps:$4 sm:$0xff]   ;;  %v2338_v18 = vld [vmem:[#allocation10 + $0x28] sm:$0xff]  }
 0x273   :  { %v1116_v38 = vmax.f32 %v1065_v30, 0.0  ;;  %v1118_v39 = vmax.f32 %v1108_v31, 0.0  ;;  %2086 = vmatpush3.bf16.msra.mxu1 %v2338_v18  ;;  %v2339_v19 = vld [vmem:[#allocation10 + $0x70] sm:$0xff]   ;;  %v2342_v22 = vld [vmem:[#allocation10 + $0x38] sm:$0xff]   ;;  %v1188_v23 = vld [vmem:[%s2667_s6] sm:$0x3] }
 0x274   :  { %v1117_v42 = vmax.f32 %v1067_v34, 0.0  ;;  %v1119_v43 = vmax.f32 %v1110_v35, 0.0  ;;  %2087 = vmatprep.subr.bf16.mxu1 %v2339_v19  ;;  %v1193_v24 = vrot.slane %v1188_v23, %v848_v11  ;;  %v1197_v25 = vrot.slane %v1188_v23, %v852_v14 }
 0x275   :  { %v1120_v44 = vpack.c.bf16 %v1116_v38, %v1112_v36  ;;  %v2633_v45 = vpack.c.bf16 %v1118_v39, %v1114_v37 }
 0x276   :  { %v1121_v46 = vpack.c.bf16 %v1117_v42, %v1113_v40  ;;  %v1123_v47 = vpack.c.bf16 %v1119_v43, %v1115_v41 }
 0x277   :  { %2088 = vmatpush3.bf16.msra.mxu1 %v2340_v20 }
 0x278   :  { %1552 = vmatprep.mubr.bf16.mxu0 %v1121_v46  ;;  %2089 = vmatprep.subr.bf16.mxu1 %v2341_v21 }
 0x279   :  { %1553 = vmatmul.mubr.bf16.vlgmr.msra.gmra.mrb[8].mxu0 %v1120_v44 }
 0x27a   :  { %1564 = vmatpush1.bf16.msra.mxu0 %v2279_v48  ;;  %1595 = vmatprep.mubr.bf16.mxu0 %v1123_v47 }
 0x27b   :  { %1565 = vmatprep.subr.bf16.mxu0 %v2284_v49  ;;  %2090 = vmatpush3.bf16.msra.mxu1 %v2342_v22 }
 0x27e   :  { %1566 = vmatpush1.bf16.msra.mxu0 %v2282_v50 }
 0x27f   :  { %1567 = vmatprep.subr.bf16.mxu0 %v2287_v51 }
 0x282   :  { %1568 = vmatpush1.bf16.msra.mxu0 %v2285_v52 }
 0x283   :  { %1569 = vmatprep.subr.bf16.mxu0 %v2290_v53 }
 0x286   :  { %1570 = vmatpush1.bf16.msra.mxu0 %v2288_v54 }
 0x287   :  { %1571 = vmatprep.subr.bf16.mxu0 %v2293_v55 }
 0x28a   :  { %1572 = vmatpush1.bf16.msra.mxu0 %v2291_v56 }
 0x28b   :  { %1573 = vmatprep.subr.bf16.mxu0 %v2296_v57 }
 0x28e   :  { %1574 = vmatpush1.bf16.msra.mxu0 %v2294_v58 }
 0x28f   :  { %1575 = vmatprep.subr.bf16.mxu0 %v2299_v59 }
 0x292   :  { %1576 = vmatpush1.bf16.msra.mxu0 %v2297_v60 }
 0x293   :  { %1577 = vmatprep.subr.bf16.mxu0 %v2302_v61 }
 0x296   :  { %1578 = vmatpush1.bf16.msra.mxu0 %v2300_v62 }
 0x297   :  { %1579 = vmatprep.subr.bf16.mxu0 %v2305_v63 }
 0x29a   :  { %1580 = vmatpush1.bf16.msra.mxu0 %v2303_v0 }
 0x29b   :  { %1581 = vmatprep.subr.bf16.mxu0 %v2308_v1 }
 0x29e   :  { %1582 = vmatpush1.bf16.msra.mxu0 %v2306_v2 }
 0x29f   :  { %1583 = vmatprep.subr.bf16.mxu0 %v2311_v3 }
 0x2a2   :  { %1584 = vmatpush1.bf16.msra.mxu0 %v2309_v4 }
 0x2a3   :  { %1585 = vmatprep.subr.bf16.mxu0 %v2314_v5 }
 0x2a6   :  { %1586 = vmatpush1.bf16.msra.mxu0 %v2312_v6 }
 0x2a7   :  { %1587 = vmatprep.subr.bf16.mxu0 %v2317_v7 }
 0x2aa   :  { %1588 = vmatpush1.bf16.msra.mxu0 %v2315_v8 }
 0x2ab   :  { %1589 = vmatprep.subr.bf16.mxu0 %v2320_v9 }
 0x2ae   :  { %1590 = vmatpush1.bf16.msra.mxu0 %v2318_v12 }
 0x2af   :  { %1591 = vmatprep.subr.bf16.mxu0 %v2323_v13 }
 0x2b2   :  { %1592 = vmatpush1.bf16.msra.mxu0 %v2321_v15 }
 0x2b3   :  { %1593 = vmatprep.subr.bf16.mxu0 %v2326_v16 }
 0x2b6   :  { %1594 = vmatpush1.bf16.msra.mxu0 %v2324_v17 }
 0x2b9   :  { %1596 = vmatmul.mubr.bf16.vlgmr.msra.gmra.mrb[8].mxu0 %v2633_v45 }
 0x38c   :  { %v1597_v26 = vpop.f32.mrb[8].mxu0 }
 0x38d   :  { %v2097_v27 = vadd.f32 %v1597_v26, %v1193_v24  ;;  %v1599_v28 = vpop.f32.mrb[9].mxu0 }
 0x38e   :  { %v2098_v29 = vadd.f32 %v1599_v28, %v1197_v25  ;;  %v1601_v30 = vpop.f32.mrb[10].mxu0 }
 0x38f   :  { %v2099_v31 = vadd.f32 %v1601_v30, %v1193_v24  ;;  %v1603_v32 = vpop.f32.mrb[11].mxu0  ;;  %v1606_v34 = vmax.f32 %v2097_v27, 0.0 }
 0x390   :  { %v2100_v33 = vadd.f32 %v1603_v32, %v1197_v25  ;;  %v1607_v36 = vmax.f32 %v2098_v29, 0.0 }
 0x391   :  { %v1608_v35 = vmax.f32 %v2099_v31, 0.0 }
 0x392   :  { %v1609_v37 = vmax.f32 %v2100_v33, 0.0 }
 0x393   :  { %v1610_v38 = vpack.c.bf16 %v1608_v35, %v1606_v34 }
 0x394   :  { %v1611_v39 = vpack.c.bf16 %v1609_v37, %v1607_v36 }
 0x396   :  { %1779 = vmatprep.mubr.bf16.mxu1 %v1611_v39 }
 0x397   :  { %1780 = vmatmul.mubr.bf16.vlgmr.msra.gmra.mrb[16].mxu1 %v1610_v38 }
 0x46a   :  { %v2091_v11 = vpop.f32.mrb[16].mxu1 }
 0x46b   :  { %v2092_v14 = vpop.f32.mrb[17].mxu1 }
 0x46c   :  { %v2093_v40 = vadd.f32 %v2092_v14, %v2091_v11  ;;  %v2094_v41 = vpop.f32.mrb[18].mxu1 }
 0x46d   :  { %v2095_v42 = vpop.f32.mrb[19].mxu1 }
 0x46e   :  { %v1782_v43 = vadd.f32 %v2093_v40, %v1970_v10  ;;  %v2096_v44 = vadd.f32 %v2095_v42, %v2094_v41 }
 0x470   :  { %1788 = vst [vmem:[#allocation11] sm:$0xff] %v1782_v43  ;;  %v1785_v45 = vadd.f32 %v2096_v44, %v1970_v10 }
 0x472   :  { %1789 = vst [vmem:[#allocation11 + $0x8] sm:$0xff] %v1785_v45 }
 0x473   :  { %2464 = shalt.err (!%p2461_p2)
}
 0x474   :  { %s2465_s16 = scalar_lea.hbm %s2670_s9, 256 }
 0x475   :  { %p2466_p3 = scmp.ne.s32.totalorder %s2670_s9, %s2465_s16  ;;  %p2469_p4 = scmp.lt.u32.totalorder %s2465_s16, %s2670_s9 }
 0x477   :  { %p2471_p5 = pnand %p2469_p4, %p2466_p3 }
 0x479   :  { %2474 = shalt.err (!%p2471_p5)
}
 0x47a   :  { %1801 = dma.vmem_to_hbm [thread:$0]  %s1796_s21, 256, %s2670_s9, [#allocation4], %s2487_s1, %s2487_s1, %s2488_s10  }
 0x47b   :  { %2481 = dma.done.wait [#allocation4], 256  }
 0x47c   :  { %2482 = vsyncadd [#allocation4], 4294967040 }
 0x47d   :  { %1805 = vsyncpa [#allocation3], 1 }
 0x47e   :  { %1806 = vsyncpa [#allocation6], 1 }
 0x47f   :  { %1807 = vsyncpa [#allocation9], 1 }
 0x480   :  { %1808 = vsyncpa [#allocation4], 1 }

</bundles_post_ra>
